<compile_context>
chip_gen: v7x
topology: tpu7x:2x2x1
jax: 0.10.0
libtpu: 0.0.40
codegen_flags: <defaults>
</compile_context>

<pallas_src>
import functools

import numpy as np
import jax
import jax.numpy as jnp
from jax import lax
from jax.experimental import pallas as pl
from jax.experimental.pallas import tpu as pltpu


def _cos_m_theta(c, m):
    """cos(m*theta) as a Horner-form polynomial in c = cos(theta). m is static."""
    c2 = c * c
    if m == 0:
        return jnp.ones_like(c)
    if m == 1:
        return c
    if m == 2:
        return 2.0 * c2 - 1.0
    if m == 3:
        return (4.0 * c2 - 3.0) * c
    if m == 4:
        return (8.0 * c2 - 8.0) * c2 + 1.0
    if m == 5:
        return ((16.0 * c2 - 20.0) * c2 + 5.0) * c
    raise ValueError("m must be in 0..5")


def _angle_linear_kernel(x_ref, w_ref, cscale_ref, xlen_ref, inv_xlen_ref,
                         cos_ref, phi_ref, acc_ref, *,
                         m, thresholds, tk, x_resident):
    k_step = pl.program_id(2)

    @pl.when(k_step == 0)
    def _init():
        acc_ref[...] = jnp.zeros_like(acc_ref)

    if x_resident:
        # x row-block (tb, Dp) is resident across j/k; slice the k-chunk.
        off = pl.multiple_of(k_step * tk, tk)
        a = x_ref[:, pl.ds(off, tk)]          # (tb, tk) bf16
    else:
        a = x_ref[...]                        # (tb, tk) bf16 streamed tile
    # bf16 MXU matmul, f32 accumulation (no in-kernel casts).
    acc_ref[...] += jnp.dot(a, w_ref[...], preferred_element_type=jnp.float32)

    @pl.when(k_step == pl.num_programs(2) - 1)
    def _epilogue():
        xlen = xlen_ref[...]                  # (tb, 1)
        inv_xlen = inv_xlen_ref[...]          # (tb, 1)
        cscale = cscale_ref[...]              # (1, tn)  == 1/||w_col|| (torch-renorm rule)

        logits = acc_ref[...] * cscale        # x @ w_normalized
        c = jnp.clip(logits * inv_xlen, -1.0, 1.0)

        cos_m = _cos_m_theta(c, m)

        # k = floor(m * acos(c) / pi) without acos:
        #   theta >= j*pi/m  <=>  c <= cos(j*pi/m)   (cos decreasing on [0, pi])
        k_int = jnp.zeros(c.shape, dtype=jnp.int32)
        for thr in thresholds:                # static unroll, m <= 5 compares
            k_int = k_int + (c <= thr).astype(jnp.int32)
        sign = (1 - 2 * (k_int & 1)).astype(jnp.float32)   # (-1)**k via parity
        phi = sign * cos_m - 2.0 * k_int.astype(jnp.float32)

        cos_ref[...] = (c * xlen).astype(cos_ref.dtype)
        phi_ref[...] = (phi * xlen).astype(phi_ref.dtype)


def _ceil_to(a, b):
    return (a + b - 1) // b * b


def _pad2(a, rows, cols):
    if rows or cols:
        return jnp.pad(a, ((0, rows), (0, cols)))
    return a


def _vmem_footprint(tb, tn, tk, Dp, x_resident):
    """Rough double-buffered VMEM footprint in bytes."""
    x_bytes = 2 * tb * (Dp if x_resident else tk) * 2     # bf16, 2 buffers
    w_bytes = 2 * tk * tn * 2                              # bf16, 2 buffers
    out_bytes = 2 * 2 * tb * tn * 4                        # two f32 outputs, 2 buffers
    acc_bytes = tb * tn * 4                                # f32 accumulator
    misc = 2 * (tn * 4 + 2 * tb * 4) + (1 << 16)           # cscale/xlen/inv_xlen + slack
    return x_bytes + w_bytes + out_bytes + acc_bytes + misc


def angle_linear(x, weight, m=4, *, tb=256, tn=1024, tk=1024, col_scale=None):
    """Pallas implementation of AngleLinear.forward.

    x:      (batch, in_features)
    weight: (in_features, out_features)  -- raw; column renorm applied here
    col_scale: optional precomputed (1, out_features) = 1/||w_col|| (hoist for
               a static weight so the renorm reduce isn't paid every call)
    returns (cos_theta, phi_theta), each (batch, out_features) float32
    """
    B, D = x.shape
    Dw, N = weight.shape
    assert D == Dw, "in_features mismatch"
    assert 0 <= m <= 5

    x32 = x.astype(jnp.float32)
    w32 = weight.astype(jnp.float32)

    # ---- hoisted reductions (one cheap XLA pass each, amortized over all tiles) ----
    # torch: w.renorm(2, 1, 1e-5).mul(1e5): columns with norm > 1e-5 become unit
    # norm; columns with norm <= 1e-5 are left untouched and just scaled by 1e5.
    if col_scale is None:
        col_norm = jnp.sqrt(jnp.sum(w32 * w32, axis=0, keepdims=True))         # (1, N)
        col_scale = jnp.where(col_norm > 1e-5,
                              1.0 / jnp.maximum(col_norm, 1e-30),
                              1e5)
    else:
        col_scale = jnp.asarray(col_scale, jnp.float32).reshape(1, N)

    xsq = jnp.sum(x32 * x32, axis=1, keepdims=True)                            # (B, 1)
    xlen = jnp.sqrt(xsq)
    # eps guards ||x|| == 0 (the PyTorch module would produce NaN there).
    inv_xlen = lax.rsqrt(jnp.maximum(xsq, 1e-24))

    # bf16 operands for the MXU / HBM stream.
    xb = x.astype(jnp.bfloat16)
    wb = weight.astype(jnp.bfloat16)

    # ---- tile selection & padding (lane-dense outputs, bf16-friendly sublanes) ----
    Bp = _ceil_to(B, 16)                      # bf16 packs 16 rows per vreg
    tb = _ceil_to(max(16, min(tb, Bp)), 16)
    Bp = _ceil_to(Bp, tb)

    Dp = _ceil_to(D, 128)
    tk = _ceil_to(max(128, min(tk, Dp)), 128)
    Dp = _ceil_to(Dp, tk)

    Np = _ceil_to(N, 128)
    tn = _ceil_to(max(128, min(tn, Np)), 128)
    Np = _ceil_to(Np, tn)

    # v7x megacore: make sure the parallel axes expose >=2 blocks when possible.
    if (Bp // tb) * (Np // tn) == 1 and Np >= 256:
        tn = _ceil_to(max(Np // 2, 128), 128)
        Np = _ceil_to(N, tn)

    # Keep the x row-block resident across the class axis if it fits a small budget.
    x_resident = (2 * tb * Dp * 2) <= (8 << 20)

    # Auto-shrink tiles to stay under a VMEM budget safe for v7x (64 MiB physical).
    budget = 40 << 20
    while _vmem_footprint(tb, tn, tk, Dp, x_resident) > budget and tn > 128:
        tn = _ceil_to(tn // 2, 128)
        Np = _ceil_to(N, tn)
    while _vmem_footprint(tb, tn, tk, Dp, x_resident) > budget and tk > 128:
        tk = _ceil_to(tk // 2, 128)
        Dp = _ceil_to(_ceil_to(D, 128), tk)
    while _vmem_footprint(tb, tn, tk, Dp, x_resident) > budget and tb > 16:
        tb = _ceil_to(tb // 2, 16)
        Bp = _ceil_to(_ceil_to(B, 16), tb)

    # Pad the bf16 copies (skipped entirely when already aligned).
    xp = _pad2(xb, Bp - B, Dp - D)
    wp = _pad2(wb, Dp - D, Np - N)
    csp = _pad2(col_scale, 0, Np - N)
    xlp = _pad2(xlen, Bp - B, 0)
    ixlp = _pad2(inv_xlen, Bp - B, 0)

    thresholds = tuple(float(np.cos(j * np.pi / m)) for j in range(1, m + 1)) if m >= 1 else ()
    kernel = functools.partial(_angle_linear_kernel, m=m, thresholds=thresholds,
                               tk=tk, x_resident=x_resident)

    if x_resident:
        x_spec = pl.BlockSpec((tb, Dp), lambda i, j, k: (i, 0))     # resident row block
    else:
        x_spec = pl.BlockSpec((tb, tk), lambda i, j, k: (i, k))     # streamed tile

    grid = (Bp // tb, Np // tn, Dp // tk)

    n_i = Bp // tb
    x_reads = Bp * Dp * 2 * (1 if x_resident else (Np // tn))
    flops = 2 * Bp * Np * Dp
    bytes_accessed = x_reads + Dp * Np * 2 * n_i + 2 * Bp * Np * 4 + Np * 4 + 2 * Bp * 4

    vmem_need = _vmem_footprint(tb, tn, tk, Dp, x_resident)
    vmem_limit = int(min(max(vmem_need + vmem_need // 4 + (4 << 20), 32 << 20), 56 << 20))

    cos_p, phi_p = pl.pallas_call(
        kernel,
        out_shape=(jax.ShapeDtypeStruct((Bp, Np), jnp.float32),
                   jax.ShapeDtypeStruct((Bp, Np), jnp.float32)),
        grid_spec=pltpu.PrefetchScalarGridSpec(
            num_scalar_prefetch=0,
            grid=grid,
            in_specs=[
                x_spec,                                              # x (bf16)
                pl.BlockSpec((tk, tn), lambda i, j, k: (k, j)),      # weight tile (bf16, streamed)
                pl.BlockSpec((1, tn), lambda i, j, k: (0, j)),       # 1/||w_col||
                pl.BlockSpec((tb, 1), lambda i, j, k: (i, 0)),       # ||x||
                pl.BlockSpec((tb, 1), lambda i, j, k: (i, 0)),       # 1/||x||
            ],
            out_specs=(
                pl.BlockSpec((tb, tn), lambda i, j, k: (i, j)),      # cos_theta * ||x||
                pl.BlockSpec((tb, tn), lambda i, j, k: (i, j)),      # phi_theta * ||x||
            ),
            scratch_shapes=[pltpu.VMEM((tb, tn), jnp.float32)],      # f32 accumulator
        ),
        compiler_params=pltpu.CompilerParams(
            dimension_semantics=("parallel", "parallel", "arbitrary"),
            vmem_limit_bytes=vmem_limit),
        cost_estimate=pl.CostEstimate(flops=flops, transcendentals=0,
                                      bytes_accessed=bytes_accessed),
    )(xp, wp, csp, xlp, ixlp)

    if Bp == B and Np == N:
        return cos_p, phi_p
    return cos_p[:B, :N], phi_p[:B, :N]


if __name__ == "__main__":
    key = jax.random.PRNGKey(0)
    kx, kw = jax.random.split(key)

    batch, in_features, out_features, m = 8, 32, 16, 4

    # Deterministic synthetic parameters: uniform(-1, 1) like the module's
    # __init__; the wrapper's column renorm makes pre-normalization irrelevant.
    weight = jax.random.uniform(kw, (in_features, out_features),
                                dtype=jnp.float32, minval=-1.0, maxval=1.0)
    x = jax.random.normal(kx, (batch, in_features), dtype=jnp.float32)

    cos_theta, phi_theta = angle_linear(x, weight, m=m)
    jax.block_until_ready(cos_theta)
    jax.block_until_ready(phi_theta)

    assert cos_theta.shape == (batch, out_features)
    assert phi_theta.shape == (batch, out_features)
    assert bool(jnp.all(jnp.isfinite(cos_theta)))
    assert bool(jnp.all(jnp.isfinite(phi_theta)))

    # Loose reference check on cos_theta (bf16 MXU vs f32 reference). phi_theta
    # can legitimately flip a k-bin for cos values near a threshold, so only
    # finiteness is asserted for it above.
    col_norm_ref = jnp.sqrt(jnp.sum(weight * weight, axis=0, keepdims=True))
    ww_ref = weight / col_norm_ref
    xlen_ref = jnp.sqrt(jnp.sum(x * x, axis=1, keepdims=True))
    cos_ref = jnp.clip((x @ ww_ref) / xlen_ref, -1.0, 1.0) * xlen_ref
    assert bool(jnp.max(jnp.abs(cos_theta - cos_ref)) < 0.1), "cos_theta mismatch"

    print("KERNEL_OK")
</pallas_src>

<mosaic_0001>
module attributes {stable_mosaic.version = 11 : i64} {
  func.func @_angle_linear_kernel(%arg0: i32, %arg1: i32, %arg2: i32, %arg3: memref<16x128xbf16, #tpu.memory_space<vmem>>, %arg4: memref<128x128xbf16, #tpu.memory_space<vmem>>, %arg5: memref<1x128xf32, #tpu.memory_space<vmem>>, %arg6: memref<16x1xf32, #tpu.memory_space<vmem>>, %arg7: memref<16x1xf32, #tpu.memory_space<vmem>>, %arg8: memref<16x128xf32, #tpu.memory_space<vmem>>, %arg9: memref<16x128xf32, #tpu.memory_space<vmem>>, %arg10: memref<16x128xf32, #tpu.memory_space<vmem>>) attributes {dimension_semantics = [#tpu.dimension_semantics<parallel>, #tpu.dimension_semantics<parallel>, #tpu.dimension_semantics<arbitrary>], iteration_bounds = array<i64: 1, 1, 1>, scalar_prefetch = 0 : i64, scratch_operands = 1 : i64, tpu.core_type = #tpu.core_type<tc>, window_params = [{transform_indices = @transform_0, window_bounds = array<i64: 16, 128>}, {transform_indices = @transform_1, window_bounds = array<i64: 128, 128>}, {transform_indices = @transform_2, window_bounds = array<i64: 1, 128>}, {transform_indices = @transform_3, window_bounds = array<i64: 16, 1>}, {transform_indices = @transform_4, window_bounds = array<i64: 16, 1>}, {transform_indices = @transform_5, window_bounds = array<i64: 16, 128>}, {transform_indices = @transform_6, window_bounds = array<i64: 16, 128>}]} {
    %c0_i32 = arith.constant 0 : i32
    %0 = arith.cmpi eq, %arg2, %c0_i32 : i32
    %1 = arith.extui %0 : i1 to i32
    %c0_i32_0 = arith.constant 0 : i32
    %2 = arith.cmpi ne, %1, %c0_i32_0 : i32
    scf.if %2 {
      %cst_9 = arith.constant 0.000000e+00 : f32
      %15 = vector.broadcast %cst_9 : f32 to vector<16x128xf32>
      %c0_10 = arith.constant 0 : index
      %c0_11 = arith.constant 0 : index
      %16 = vector.load %arg10[%c0_10, %c0_11] : memref<16x128xf32, #tpu.memory_space<vmem>>, vector<16x128xf32>
      tpu.vector_store %arg10[%c0_10, %c0_11], %15 {strides = array<i32>} : memref<16x128xf32, #tpu.memory_space<vmem>>, vector<16x128xf32>,
    } else {
    }
    %c128_i32 = arith.constant 128 : i32
    %3 = arith.muli %arg2, %c128_i32 : i32
    %4 = tpu.assume_multiple %3, 128 : i32
    %c0 = arith.constant 0 : index
    %5 = arith.index_cast %4 : i32 to index
    %6 = vector.load %arg3[%c0, %5] : memref<16x128xbf16, #tpu.memory_space<vmem>>, vector<16x128xbf16>
    %c0_1 = arith.constant 0 : index
    %c0_2 = arith.constant 0 : index
    %7 = vector.load %arg10[%c0_1, %c0_2] : memref<16x128xf32, #tpu.memory_space<vmem>>, vector<16x128xf32>
    %c0_3 = arith.constant 0 : index
    %c0_4 = arith.constant 0 : index
    %8 = vector.load %arg4[%c0_3, %c0_4] : memref<128x128xbf16, #tpu.memory_space<vmem>>, vector<128x128xbf16>
    %cst = arith.constant dense<0.000000e+00> : vector<16x128xf32>
    %9 = tpu.matmul %6, %8, %cst {dimension_numbers = #tpu.dot_dimension_numbers<[1], [0], [0], [1], [0, 0, 1, 1], [], []>} : vector<16x128xbf16>, vector<128x128xbf16>, vector<16x128xf32> -> vector<16x128xf32>
    %10 = arith.addf %7, %9 : vector<16x128xf32>
    %c0_5 = arith.constant 0 : index
    %c0_6 = arith.constant 0 : index
    %11 = vector.load %arg10[%c0_5, %c0_6] : memref<16x128xf32, #tpu.memory_space<vmem>>, vector<16x128xf32>
    tpu.vector_store %arg10[%c0_5, %c0_6], %10 {strides = array<i32>} : memref<16x128xf32, #tpu.memory_space<vmem>>, vector<16x128xf32>,
    %c0_i32_7 = arith.constant 0 : i32
    %12 = arith.cmpi eq, %arg2, %c0_i32_7 : i32
    %13 = arith.extui %12 : i1 to i32
    %c0_i32_8 = arith.constant 0 : i32
    %14 = arith.cmpi ne, %13, %c0_i32_8 : i32
    scf.if %14 {
      %c0_9 = arith.constant 0 : index
      %c0_10 = arith.constant 0 : index
      %15 = vector.load %arg6[%c0_9, %c0_10] : memref<16x1xf32, #tpu.memory_space<vmem>>, vector<16x1xf32>
      %c0_11 = arith.constant 0 : index
      %c0_12 = arith.constant 0 : index
      %16 = vector.load %arg7[%c0_11, %c0_12] : memref<16x1xf32, #tpu.memory_space<vmem>>, vector<16x1xf32>
      %c0_13 = arith.constant 0 : index
      %c0_14 = arith.constant 0 : index
      %17 = vector.load %arg5[%c0_13, %c0_14] : memref<1x128xf32, #tpu.memory_space<vmem>>, vector<1x128xf32>
      %c0_15 = arith.constant 0 : index
      %c0_16 = arith.constant 0 : index
      %18 = vector.load %arg10[%c0_15, %c0_16] : memref<16x128xf32, #tpu.memory_space<vmem>>, vector<16x128xf32>
      %19 = vector.broadcast %17 : vector<1x128xf32> to vector<16x128xf32>
      %20 = arith.mulf %18, %19 : vector<16x128xf32>
      %21 = vector.broadcast %16 : vector<16x1xf32> to vector<16x128xf32>
      %22 = arith.mulf %20, %21 : vector<16x128xf32>
      %cst_17 = arith.constant -1.000000e+00 : f32
      %cst_18 = arith.constant 1.000000e+00 : f32
      %23 = vector.broadcast %cst_17 : f32 to vector<16x128xf32>
      %24 = arith.maximumf %23, %22 : vector<16x128xf32>
      %25 = vector.broadcast %cst_18 : f32 to vector<16x128xf32>
      %26 = arith.minimumf %25, %24 : vector<16x128xf32>
      %27 = arith.mulf %26, %26 : vector<16x128xf32>
      %cst_19 = arith.constant 8.000000e+00 : f32
      %28 = vector.broadcast %cst_19 : f32 to vector<16x128xf32>
      %29 = arith.mulf %28, %27 : vector<16x128xf32>
      %cst_20 = arith.constant 8.000000e+00 : f32
      %30 = vector.broadcast %cst_20 : f32 to vector<16x128xf32>
      %31 = arith.subf %29, %30 : vector<16x128xf32>
      %32 = arith.mulf %31, %27 : vector<16x128xf32>
      %cst_21 = arith.constant 1.000000e+00 : f32
      %33 = vector.broadcast %cst_21 : f32 to vector<16x128xf32>
      %34 = arith.addf %32, %33 : vector<16x128xf32>
      %c0_i32_22 = arith.constant 0 : i32
      %35 = vector.broadcast %c0_i32_22 : i32 to vector<16x128xi32>
      %cst_23 = arith.constant 0.707106769 : f32
      %36 = vector.broadcast %cst_23 : f32 to vector<16x128xf32>
      %37 = arith.cmpf ole, %26, %36 : vector<16x128xf32>
      %38 = arith.extui %37 : vector<16x128xi1> to vector<16x128xi32>
      %39 = arith.addi %35, %38 : vector<16x128xi32>
      %cst_24 = arith.constant 6.12323426E-17 : f32
      %40 = vector.broadcast %cst_24 : f32 to vector<16x128xf32>
      %41 = arith.cmpf ole, %26, %40 : vector<16x128xf32>
      %42 = arith.extui %41 : vector<16x128xi1> to vector<16x128xi32>
      %43 = arith.addi %39, %42 : vector<16x128xi32>
      %cst_25 = arith.constant -0.707106769 : f32
      %44 = vector.broadcast %cst_25 : f32 to vector<16x128xf32>
      %45 = arith.cmpf ole, %26, %44 : vector<16x128xf32>
      %46 = arith.extui %45 : vector<16x128xi1> to vector<16x128xi32>
      %47 = arith.addi %43, %46 : vector<16x128xi32>
      %cst_26 = arith.constant -1.000000e+00 : f32
      %48 = vector.broadcast %cst_26 : f32 to vector<16x128xf32>
      %49 = arith.cmpf ole, %26, %48 : vector<16x128xf32>
      %50 = arith.extui %49 : vector<16x128xi1> to vector<16x128xi32>
      %51 = arith.addi %47, %50 : vector<16x128xi32>
      %c1_i32 = arith.constant 1 : i32
      %52 = vector.broadcast %c1_i32 : i32 to vector<16x128xi32>
      %53 = arith.andi %51, %52 : vector<16x128xi32>
      %c2_i32 = arith.constant 2 : i32
      %54 = vector.broadcast %c2_i32 : i32 to vector<16x128xi32>
      %55 = arith.muli %54, %53 : vector<16x128xi32>
      %c1_i32_27 = arith.constant 1 : i32
      %56 = vector.broadcast %c1_i32_27 : i32 to vector<16x128xi32>
      %57 = arith.subi %56, %55 : vector<16x128xi32>
      %58 = arith.sitofp %57 : vector<16x128xi32> to vector<16x128xf32>
      %59 = arith.mulf %58, %34 : vector<16x128xf32>
      %60 = arith.sitofp %51 : vector<16x128xi32> to vector<16x128xf32>
      %cst_28 = arith.constant 2.000000e+00 : f32
      %61 = vector.broadcast %cst_28 : f32 to vector<16x128xf32>
      %62 = arith.mulf %61, %60 : vector<16x128xf32>
      %63 = arith.subf %59, %62 : vector<16x128xf32>
      %64 = vector.broadcast %15 : vector<16x1xf32> to vector<16x128xf32>
      %65 = arith.mulf %26, %64 : vector<16x128xf32>
      %c0_29 = arith.constant 0 : index
      %c0_30 = arith.constant 0 : index
      %66 = vector.load %arg8[%c0_29, %c0_30] : memref<16x128xf32, #tpu.memory_space<vmem>>, vector<16x128xf32>
      tpu.vector_store %arg8[%c0_29, %c0_30], %65 {strides = array<i32>} : memref<16x128xf32, #tpu.memory_space<vmem>>, vector<16x128xf32>,
      %67 = vector.broadcast %15 : vector<16x1xf32> to vector<16x128xf32>
      %68 = arith.mulf %63, %67 : vector<16x128xf32>
      %c0_31 = arith.constant 0 : index
      %c0_32 = arith.constant 0 : index
      %69 = vector.load %arg9[%c0_31, %c0_32] : memref<16x128xf32, #tpu.memory_space<vmem>>, vector<16x128xf32>
      tpu.vector_store %arg9[%c0_31, %c0_32], %68 {strides = array<i32>} : memref<16x128xf32, #tpu.memory_space<vmem>>, vector<16x128xf32>,
    } else {
    }
    return
  }
  func.func @transform_0(%arg0: i32, %arg1: i32, %arg2: i32) -> (i32, i32) {
    %c0_i32 = arith.constant 0 : i32
    %c0_i32_0 = arith.constant 0 : i32
    return %arg0, %c0_i32 : i32, i32
  }
  func.func @transform_1(%arg0: i32, %arg1: i32, %arg2: i32) -> (i32, i32) {
    %c0_i32 = arith.constant 0 : i32
    return %arg2, %arg1 : i32, i32
  }
  func.func @transform_2(%arg0: i32, %arg1: i32, %arg2: i32) -> (i32, i32) {
    %c0_i32 = arith.constant 0 : i32
    %c0_i32_0 = arith.constant 0 : i32
    return %c0_i32, %arg1 : i32, i32
  }
  func.func @transform_3(%arg0: i32, %arg1: i32, %arg2: i32) -> (i32, i32) {
    %c0_i32 = arith.constant 0 : i32
    %c0_i32_0 = arith.constant 0 : i32
    return %arg0, %c0_i32 : i32, i32
  }
  func.func @transform_4(%arg0: i32, %arg1: i32, %arg2: i32) -> (i32, i32) {
    %c0_i32 = arith.constant 0 : i32
    %c0_i32_0 = arith.constant 0 : i32
    return %arg0, %c0_i32 : i32, i32
  }
  func.func @transform_5(%arg0: i32, %arg1: i32, %arg2: i32) -> (i32, i32) {
    %c0_i32 = arith.constant 0 : i32
    return %arg0, %arg1 : i32, i32
  }
  func.func @transform_6(%arg0: i32, %arg1: i32, %arg2: i32) -> (i32, i32) {
    %c0_i32 = arith.constant 0 : i32
    return %arg0, %arg1 : i32, i32
  }
}

</mosaic_0001>

<bundles_post_ra>
// kernel: tpu_custom_call.1
= control target key start
LH: loop header
LB: loop body
LE: loop exit
PB: predicated region body
PF: predicated region fallthrough
CT: control target
= control target key end

     0   :  { %12 = vsyncpa [#allocation4], 0  ;;  %s559_s0 = inlined_call_operand.vmem [shape: bf16[16,128], index: 0, kind: input, shape index: {}]   ;;  %s560_s1 = inlined_call_operand.hbm [shape: bf16[128,128], index: 1, kind: input, shape index: {}]   ;;  %s561_s2 = inlined_call_operand.vmem [shape: f32[1,128], index: 2, kind: input, shape index: {}]   ;;  %s562_s3 = inlined_call_operand.vmem [shape: f32[16,1], index: 3, kind: input, shape index: {}]   ;;  %s563_s4 = inlined_call_operand.vmem [shape: f32[16,1], index: 4, kind: input, shape index: {}]   ;;  %s564_s5 = inlined_call_operand.hbm [shape: f32[16,128], index: 5, kind: output, shape index: {0}]   ;;  %s565_s6 = inlined_call_operand.hbm [shape: f32[16,128], index: 6, kind: output, shape index: {1}]  }
   0x1   :  { %13 = vsyncpa [#allocation5], 0 }
   0x2   :  { %14 = vsyncpa [#allocation8], 0  ;;  %s440_s21 = smov [#allocation3]   ;;  %s368_s25 = scalar_lea.hbm %s560_s1, 1024 }
   0x3   :  { %s22_s22 = sshll.u32 %s440_s21, 4  ;;  %p369_p0 = scmp.ne.s32.totalorder %s560_s1, %s368_s25  ;;  %s23_s22 = int_to_ptr.vmem [resolvable:$true] %s22_s22 }
   0x4   :  { %p372_p1 = scmp.lt.u32.totalorder %s368_s25, %s560_s1 }
   0x6   :  { %p374_p2 = pnand %p372_p1, %p369_p0 }
   0x8   :  { %377 = shalt.err (!%p374_p2)
}
   0x9   :  { %s378_s30 = scalar_lea.vmem %s23_s22, 1024  ;;  %p383_p4 = scmp.lt.s32.totalorder %s23_s22, %s23_s22 }
   0xa   :  { %p379_p3 = scmp.ne.s32.totalorder %s23_s22, %s378_s30  ;;  %p384_p5 = scmp.lt.s32.totalorder %s378_s30, %s378_s30 }
   0xc   :  { %p385_p6 = por %p384_p5, %p383_p4 }
   0xe   :  { %p386_p7 = pnand %p385_p6, %p379_p3 }
  0x10   :  { %389 = shalt.err (!%p386_p7)
}
  0x11   :  { %s441_s7 = smov 64   ;;  %s442_s8 = smov 4  }
  0x12   :  { %28 = dma.hbm_to_vmem [thread:$0]  %s560_s1, 1024, %s23_s22, [#allocation4], %s441_s7, %s441_s7, %s442_s8  }
  0x13   :  { %434 = dma.done.wait [#allocation4], 1024  }
  0x14   :  { %435 = vsyncadd [#allocation4], 4294966272  ;;  %v443_v0 = vmov 0.0   ;;  %vm444_vm0 = vmmov 0   ;;  %v445_v1 = vmov 0   ;;  %v359_v2 = vld [vmem:[#allocation3] sm:$0xff]  }
  0x15   :  { %327 = vmatprep.subr.bf16.mxu0 %v443_v0  ;;  %343 = vmatprep.mubr.msk.bf16.mxu0 %vm444_vm0, %v443_v0  ;;  %v360_v3 = vld [vmem:[#allocation3 + $0x8] sm:$0xff]   ;;  %v361_v4 = vld [vmem:[#allocation3 + $0x10] sm:$0xff]   ;;  %v174_v5 = vld [vmem:[%s563_s4] sm:$0xff] }
  0x16   :  { %357 = vset.pattern.permute.xlu0 %v445_v1  ;;  %358 = vset.pattern.permute.xlu1 %v445_v1  ;;  %v172_v6 = vld [vmem:[%s562_s3] sm:$0xff]  ;;  %v362_v7 = vld [vmem:[#allocation3 + $0x18] sm:$0xff]   ;;  %v175_v8 = vld [vmem:[%s563_s4 + $0x8] sm:$0xff] }
  0x17   :  { %328 = vmatpush3.bf16.msra.mxu0 %v359_v2  ;;  %189 = vperm.xlu0 %357, %v174_v5   ;;  %v173_v9 = vld [vmem:[%s562_s3 + $0x8] sm:$0xff]  ;;  %v363_v10 = vld [vmem:[#allocation3 + $0x20] sm:$0xff]   ;;  %v365_v12 = vld [vmem:[#allocation3 + $0x30] sm:$0xff]  }
  0x18   :  { %329 = vmatprep.subr.bf16.mxu0 %v443_v0  ;;  %253 = vperm.xlu1 %358, %v172_v6   ;;  %v364_v11 = vld [vmem:[#allocation3 + $0x28] sm:$0xff]   ;;  %v366_v13 = vld [vmem:[#allocation3 + $0x38] sm:$0xff]   ;;  %v367_v14 = vld [vmem:[%s559_s0] sm:$0xff]   ;;  %s446_s0 = smov [#allocation6]  }
  0x19   :  { %v313_v16 = vld [vmem:[%s561_s2] ss:$0 sm:$0xff]  ;;  %s274_s2 = sshll.u32 %s446_s0, 4  ;;  %s275_s2 = int_to_ptr.vmem [resolvable:$true] %s274_s2 }
  0x1a   :  { %s390_s20 = scalar_lea.vmem %s275_s2, 256  ;;  %p395_p9 = scmp.lt.s32.totalorder %s275_s2, %s275_s2 }
  0x1b   :  { %330 = vmatpush3.bf16.msra.mxu0 %v360_v3  ;;  %194 = vperm.xlu0 %357, %v175_v8   ;;  %p391_p8 = scmp.ne.s32.totalorder %s275_s2, %s390_s20  ;;  %p396_p10 = scmp.lt.s32.totalorder %s390_s20, %s390_s20 }
  0x1c   :  { %331 = vmatprep.subr.bf16.mxu0 %v443_v0  ;;  %258 = vperm.xlu1 %358, %v173_v9  }
  0x1d   :  { %p397_p11 = por %p396_p10, %p395_p9 }
  0x1f   :  { %332 = vmatpush3.bf16.msra.mxu0 %v361_v4  ;;  %p398_p12 = pnand %p397_p11, %p391_p8 }
  0x20   :  { %333 = vmatprep.subr.bf16.mxu0 %v443_v0 }
  0x23   :  { %334 = vmatpush3.bf16.msra.mxu0 %v362_v7 }
  0x24   :  { %335 = vmatprep.subr.bf16.mxu0 %v443_v0 }
  0x27   :  { %336 = vmatpush3.bf16.msra.mxu0 %v363_v10 }
  0x28   :  { %337 = vmatprep.subr.bf16.mxu0 %v443_v0 }
  0x2b   :  { %338 = vmatpush3.bf16.msra.mxu0 %v364_v11 }
  0x2c   :  { %339 = vmatprep.subr.bf16.mxu0 %v443_v0 }
  0x2f   :  { %340 = vmatpush3.bf16.msra.mxu0 %v365_v12 }
  0x30   :  { %341 = vmatprep.subr.bf16.mxu0 %v443_v0 }
  0x33   :  { %342 = vmatpush3.bf16.msra.mxu0 %v366_v13 }
  0x36   :  { %344 = vmatmul.mubr.bf16.vlgmr.msra.gmra.mrb[0].mxu0 %v367_v14 }
  0x96   :  { %v190_v15 = vpop.permute.xlu0 %189 }
  0x97   :  { %v517_v27 = vpop.permute.xlu1 %253 }
  0x9a   :  { %v195_v24 = vpop.permute.xlu0 %194 }
  0x9b   :  { %v259_v39 = vpop.permute.xlu1 %258 }
 0x109   :  { %v158_v17 = vpop.f32.mrb[0].mxu0 }
 0x10a   :  { %v185_v18 = vmul.f32 %v313_v16, %v158_v17  ;;  %v345_v19 = vpop.f32.mrb[1].mxu0 }
 0x10b   :  { %v161_v20 = vpop.f32.mrb[2].mxu0 }
 0x10c   :  { %v197_v21 = vmul.f32 %v190_v15, %v185_v18  ;;  %v186_v22 = vmul.f32 %v313_v16, %v161_v20  ;;  %v346_v23 = vpop.f32.mrb[3].mxu0 }
 0x10e   :  { %v314_v25 = vclamps-f32 %v197_v21, 1.0  ;;  %v198_v26 = vmul.f32 %v195_v24, %v186_v22 }
 0x110   :  { %v315_v28 = vclamps-f32 %v198_v26, 1.0  ;;  %v203_v29 = vmul.f32 %v314_v25, %v314_v25  ;;  %vm213_vm1 = vcmp.le.f32.partialorder %v314_v25, 0.70710677  ;;  %vm217_vm2 = vcmp.le.f32.partialorder %v314_v25, 6.123234e-17 }
 0x111   :  { %v215_v30 = vsel %vm213_vm1, 1, %v445_v1  ;;  %v219_v31 = vsel %vm217_vm2, 1, %v445_v1  ;;  %vm223_vm3 = vcmp.le.f32.partialorder %v314_v25, -0.70710677  ;;  %vm229_vm4 = vcmp.le.f32.partialorder %v314_v25, -1.0 }
 0x112   :  { %v205_v32 = vmul.f32 8.0, %v203_v29  ;;  %v221_v33 = vadd.s32 %v219_v31, %v215_v30  ;;  %v225_v34 = vsel %vm223_vm3, 1, %v445_v1  ;;  %v261_v35 = vmul.f32 %v314_v25, %v517_v27 }
 0x113   :  { %v204_v36 = vmul.f32 %v315_v28, %v315_v28  ;;  %vm214_vm5 = vcmp.le.f32.partialorder %v315_v28, 0.70710677  ;;  %vm218_vm6 = vcmp.le.f32.partialorder %v315_v28, 6.123234e-17  ;;  %v231_v38 = vsel %vm229_vm4, 1, %v445_v1 }
 0x114   :  { %v227_v37 = vadd.s32 %v225_v34, %v221_v33  ;;  %v216_v40 = vsel %vm214_vm5, 1, %v445_v1  ;;  %v220_v41 = vsel %vm218_vm6, 1, %v445_v1  ;;  %263 = vst [vmem:[#allocation6] sm:$0xff] %v261_v35  ;;  %vm224_vm7 = vcmp.le.f32.partialorder %v315_v28, -0.70710677 }
 0x115   :  { %v206_v42 = vmul.f32 8.0, %v204_v36  ;;  %v222_v43 = vadd.s32 %v220_v41, %v216_v40  ;;  %vm230_vm8 = vcmp.le.f32.partialorder %v315_v28, -1.0  ;;  %v316_v44 = vadd.f32 -8.0, %v205_v32 }
 0x116   :  { %v233_v45 = vadd.s32 %v231_v38, %v227_v37  ;;  %v226_v46 = vsel %vm224_vm7, 1, %v445_v1  ;;  %v262_v48 = vmul.f32 %v315_v28, %v259_v39  ;;  %v232_v50 = vsel %vm230_vm8, 1, %v445_v1 }
 0x117   :  { %v228_v47 = vadd.s32 %v226_v46, %v222_v43  ;;  %v317_v51 = vadd.f32 -8.0, %v206_v42  ;;  %v209_v53 = vmul.f32 %v316_v44, %v203_v29 }
 0x118   :  { %v235_v49 = vand.u32 1, %v233_v45  ;;  %264 = vst [vmem:[#allocation6 + $0x8] sm:$0xff] %v262_v48 }
 0x119   :  { %v234_v52 = vadd.s32 %v232_v50, %v228_v47 }
 0x11a   :  { %v237_v54 = vmul.u32 2, %v235_v49 }
 0x11b   :  { %401 = shalt.err (!%p398_p12)
}
 0x11c   :  { %s402_s23 = scalar_lea.hbm %s564_s5, 256 }
 0x11d   :  { %p403_p13 = scmp.ne.s32.totalorder %s564_s5, %s402_s23  ;;  %p406_p0 = scmp.lt.u32.totalorder %s402_s23, %s564_s5 }
 0x11f   :  { %p408_p1 = pnand %p406_p0, %p403_p13 }
 0x121   :  { %411 = shalt.err (!%p408_p1)
}
 0x122   :  { %s447_s28 = smov 128   ;;  %s448_s29 = smov 8   ;;  %v236_v55 = vand.u32 1, %v234_v52  ;;  %v239_v56 = vsub.s32 1, %v237_v54  ;;  %v245_v57 = vcvt.s32.f32 %v233_v45  ;;  %v210_v58 = vmul.f32 %v317_v51, %v204_v36 }
 0x123   :  { %280 = dma.vmem_to_hbm [thread:$0]  %s275_s2, 256, %s564_s5, [#allocation5], %s447_s28, %s447_s28, %s448_s29   ;;  %v211_v60 = vadd.f32 1.0, %v209_v53  ;;  %v246_v63 = vcvt.s32.f32 %v234_v52 }
 0x124   :  { %v238_v59 = vmul.u32 2, %v236_v55  ;;  %v241_v61 = vcvt.s32.f32 %v239_v56  ;;  %v247_v1 = vmul.f32 2.0, %v245_v57  ;;  %v212_v2 = vadd.f32 1.0, %v210_v58  ;;  %s449_s8 = smov [#allocation7]  }
 0x125   :  { %v248_v6 = vmul.f32 2.0, %v246_v63  ;;  %s286_s5 = sshll.u32 %s449_s8, 4  ;;  %s287_s5 = int_to_ptr.vmem [resolvable:$true] %s286_s5 }
 0x126   :  { %v240_v62 = vsub.s32 1, %v238_v59  ;;  %v243_v0 = vmul.f32 %v241_v61, %v211_v60  ;;  %s412_s9 = scalar_lea.vmem %s287_s5, 256  ;;  %p417_p3 = scmp.lt.s32.totalorder %s287_s5, %s287_s5 }
 0x127   :  { %p413_p2 = scmp.ne.s32.totalorder %s287_s5, %s412_s9  ;;  %p418_p4 = scmp.lt.s32.totalorder %s412_s9, %s412_s9 }
 0x128   :  { %v242_v3 = vcvt.s32.f32 %v240_v62  ;;  %v249_v4 = vsub.f32 %v243_v0, %v247_v1 }
 0x129   :  { %p419_p5 = por %p418_p4, %p417_p3 }
 0x12a   :  { %v244_v5 = vmul.f32 %v242_v3, %v212_v2  ;;  %v265_v7 = vmul.f32 %v517_v27, %v249_v4 }
 0x12b   :  { %p420_p6 = pnand %p419_p5, %p413_p2 }
 0x12c   :  { %v250_v8 = vsub.f32 %v244_v5, %v248_v6  ;;  %267 = vst [vmem:[#allocation7] sm:$0xff] %v265_v7 }
 0x12e   :  { %v266_v9 = vmul.f32 %v259_v39, %v250_v8 }
 0x130   :  { %268 = vst [vmem:[#allocation7 + $0x8] sm:$0xff] %v266_v9 }
 0x131   :  { %423 = shalt.err (!%p420_p6)
}
 0x132   :  { %s424_s1 = scalar_lea.hbm %s565_s6, 256 }
 0x133   :  { %p425_p7 = scmp.ne.s32.totalorder %s565_s6, %s424_s1  ;;  %p428_p8 = scmp.lt.u32.totalorder %s424_s1, %s565_s6 }
 0x135   :  { %p430_p9 = pnand %p428_p8, %p425_p7 }
 0x137   :  { %433 = shalt.err (!%p430_p9)
}
 0x138   :  { %292 = dma.vmem_to_hbm [thread:$0]  %s287_s5, 256, %s565_s6, [#allocation8], %s447_s28, %s447_s28, %s448_s29  }
 0x139   :  { %436 = dma.done.wait [#allocation5], 256  }
 0x13a   :  { %437 = vsyncadd [#allocation5], 4294967040 }
 0x13b   :  { %438 = dma.done.wait [#allocation8], 256  }
 0x13c   :  { %439 = vsyncadd [#allocation8], 4294967040 }
 0x13d   :  { %299 = vsyncpa [#allocation4], 1 }
 0x13e   :  { %300 = vsyncpa [#allocation5], 1 }
 0x13f   :  { %301 = vsyncpa [#allocation8], 1 }

</bundles_post_ra>
